<compile_context>
chip_gen: v5e
topology: v5e:2x2
jax: 0.10.0
libtpu: 0.0.40
codegen_flags: <defaults>
</compile_context>

<pallas_src>
import functools

import jax
import jax.numpy as jnp
from jax.experimental import pallas as pl
from jax.experimental.pallas import tpu as pltpu


# -----------------------------------------------------------------------------
# Kernel 1: fused QKV projection -> single lane-dense (B, N, 3C) buffer.
# -----------------------------------------------------------------------------
def _qkv_proj_kernel(x_ref, wqkv_ref, qkv_ref):
    # x_ref: (1, tn, C); wqkv_ref: (C, 3C); qkv_ref: (1, tn, 3C)
    y = jnp.dot(x_ref[0], wqkv_ref[...], preferred_element_type=jnp.float32)
    # TODO(synk): if the module is ever configured with qkv_bias=True, add the
    # fused q/k/v biases to `y` here (single VPU add under the MXU matmul).
    qkv_ref[0] = y.astype(qkv_ref.dtype)        # one cast, one lane-dense store


# -----------------------------------------------------------------------------
# Kernel 2: flash attention with online softmax.
#   Processes `group` heads per grid step (group == 1 when head_dim % 128 == 0,
#   group == 128 // head_dim otherwise so blocks stay 128-lane dense).
# -----------------------------------------------------------------------------
def _flash_attn_kernel(q_ref, k_ref, v_ref, o_ref, m_sc, l_sc, acc_sc, *,
                       group, head_dim):
    # q_ref: (1, tq, G*D); k_ref/v_ref: (1, tk, G*D); o_ref: (1, tq, G*D)
    ki = pl.program_id(3)

    @pl.when(ki == 0)
    def _():
        m_sc[...] = jnp.full(m_sc.shape, -jnp.inf, dtype=m_sc.dtype)
        l_sc[...] = jnp.zeros(l_sc.shape, dtype=l_sc.dtype)
        acc_sc[...] = jnp.zeros(acc_sc.shape, dtype=acc_sc.dtype)

    q = q_ref[0]
    k = k_ref[0]
    v = v_ref[0]

    # Static unroll over the (small) head group.  For group == 1 the slices
    # are the full tile and lower to nothing.
    for g in range(group):
        lo = g * head_dim
        qg = q[:, lo:lo + head_dim]
        kg = k[:, lo:lo + head_dim]
        vg = v[:, lo:lo + head_dim]

        # (tq, tk) scores: NT-form dot_general (no explicit transpose of K),
        # native-dtype operands, f32 accumulation.  The softmax scale was
        # folded into Wq, so there is no per-element multiply here.
        s = jax.lax.dot_general(qg, kg, (((1,), (1,)), ((), ())),
                                preferred_element_type=jnp.float32)

        m_prev = m_sc[g]
        m_new = jnp.maximum(m_prev, jnp.max(s, axis=-1, keepdims=True))
        alpha = jnp.exp(m_prev - m_new)
        p = jnp.exp(s - m_new)                       # f32 on the EUP
        l_sc[g] = alpha * l_sc[g] + jnp.sum(p, axis=-1, keepdims=True)
        acc_sc[g] = alpha * acc_sc[g] + jnp.dot(
            p.astype(vg.dtype), vg, preferred_element_type=jnp.float32)
        m_sc[g] = m_new

    @pl.when(ki == pl.num_programs(3) - 1)
    def _():
        # Exact normalization (review correctness note): the divide is over a
        # (tq, D)/(tq, 1) once per q-tile, essentially free.
        parts = [acc_sc[g] / l_sc[g] for g in range(group)]
        o = parts[0] if group == 1 else jnp.concatenate(parts, axis=-1)
        o_ref[0] = o.astype(o_ref.dtype)


# -----------------------------------------------------------------------------
# Kernel 3: output projection (+ bias) on the lane-dense ctx tile.
# -----------------------------------------------------------------------------
def _out_proj_kernel(ctx_ref, wp_ref, b_ref, o_ref):
    # ctx_ref: (1, tn, C); wp_ref: (C, C); b_ref: (1, C); o_ref: (1, tn, C)
    y = jnp.dot(ctx_ref[0], wp_ref[...], preferred_element_type=jnp.float32)
    o_ref[0] = (y + b_ref[...].astype(jnp.float32)).astype(o_ref.dtype)


# -----------------------------------------------------------------------------
# Wrapper
# -----------------------------------------------------------------------------
def attention_pallas(x, wq, wk, wv, wp, bp, *, num_heads, qk_scale=None,
                     block_n=512, block_q=512, block_kv=512,
                     vmem_limit_bytes=64 * 1024 * 1024):
    """Multi-head self-attention matching video_vit.Attention.forward.

    x: (B, N, C).  wq/wk/wv/wp: torch nn.Linear weights, shape (out, in)=(C, C).
    bp: (C,) proj bias.  Returns (B, N, C).
    """
    B, N, C = x.shape
    H = num_heads
    assert C % H == 0, "dim should be divisible by num_heads"
    D = C // H
    scale = float(qk_scale) if qk_scale is not None else D ** (-0.5)

    # Head grouping so every flash-kernel block is a lane-dense multiple of 128.
    if D % 128 == 0:
        G = 1
    else:
        assert 128 % D == 0 and H % (128 // D) == 0, (
            "head_dim must be a multiple of 128, or divide 128 with num_heads "
            "divisible by 128 // head_dim")
        # TODO(synk): generalize to arbitrary head_dim (pad D to the next lane
        # multiple, or fall back to a head-major layout).
        G = 128 // D
    HG = H // G                     # number of head groups
    GD = G * D                      # lane width handled per flash-kernel step

    tn = min(block_n, N)
    tq = min(block_q, N)
    tk = min(block_kv, N)
    assert N % tn == 0 and N % tq == 0 and N % tk == 0, (
        "sequence length must be divisible by the chosen tile sizes")

    # One-time parameter glue (outside the hot path): fold the softmax scale
    # into Wq, fuse Q/K/V weights into one (C, 3C) matrix, pre-transpose to
    # (in, out) layout so kernels compute y = x @ W (+ b).
    # TODO(synk): cache wqkv/wp_t/bp_2d across calls when weights are static.
    wqkv = jnp.concatenate([wq.T * scale, wk.T, wv.T], axis=1)   # (C, 3C)
    wp_t = wp.T                                                  # (C, C)
    bp_2d = bp.reshape(1, C)
    dtype = x.dtype

    # ---- 1) fused QKV projection -> lane-dense (B, N, 3C) -------------------
    qkv = pl.pallas_call(
        _qkv_proj_kernel,
        out_shape=jax.ShapeDtypeStruct((B, N, 3 * C), dtype),
        grid_spec=pltpu.PrefetchScalarGridSpec(
            num_scalar_prefetch=0,
            grid=(B, N // tn),
            in_specs=[
                pl.BlockSpec((1, tn, C), lambda b, n: (b, n, 0)),
                pl.BlockSpec((C, 3 * C), lambda b, n: (0, 0)),   # invariant weight
            ],
            out_specs=pl.BlockSpec((1, tn, 3 * C), lambda b, n: (b, n, 0)),
        ),
        compiler_params=pltpu.CompilerParams(
            dimension_semantics=("parallel", "parallel"),
            vmem_limit_bytes=vmem_limit_bytes),
    )(x, wqkv)

    # ---- 2) flash attention, grid (B, head-groups, q-tiles, kv-tiles) -------
    # q/k/v blocks are sliced straight out of the (B, N, 3C) buffer by the
    # index_map (block index along the lane axis); ctx goes out lane-dense.
    ctx = pl.pallas_call(
        functools.partial(_flash_attn_kernel, group=G, head_dim=D),
        out_shape=jax.ShapeDtypeStruct((B, N, C), dtype),
        grid_spec=pltpu.PrefetchScalarGridSpec(
            num_scalar_prefetch=0,
            grid=(B, HG, N // tq, N // tk),
            in_specs=[
                pl.BlockSpec((1, tq, GD),
                             lambda b, hg, qi, ki: (b, qi, hg)),            # Q
                pl.BlockSpec((1, tk, GD),
                             lambda b, hg, qi, ki: (b, ki, HG + hg)),       # K
                pl.BlockSpec((1, tk, GD),
                             lambda b, hg, qi, ki: (b, ki, 2 * HG + hg)),   # V
            ],
            out_specs=pl.BlockSpec((1, tq, GD),
                                   lambda b, hg, qi, ki: (b, qi, hg)),
            scratch_shapes=[
                pltpu.VMEM((G, tq, 1), jnp.float32),   # running max  m
                pltpu.VMEM((G, tq, 1), jnp.float32),   # running sum  l
                pltpu.VMEM((G, tq, D), jnp.float32),   # output accumulator
            ],
        ),
        compiler_params=pltpu.CompilerParams(
            dimension_semantics=("parallel", "parallel", "parallel", "arbitrary"),
            vmem_limit_bytes=vmem_limit_bytes),
    )(qkv, qkv, qkv)

    # ---- 3) output projection (+ bias), lane-dense in and out ---------------
    out = pl.pallas_call(
        _out_proj_kernel,
        out_shape=jax.ShapeDtypeStruct((B, N, C), dtype),
        grid_spec=pltpu.PrefetchScalarGridSpec(
            num_scalar_prefetch=0,
            grid=(B, N // tn),
            in_specs=[
                pl.BlockSpec((1, tn, C), lambda b, n: (b, n, 0)),
                pl.BlockSpec((C, C), lambda b, n: (0, 0)),       # invariant weight
                pl.BlockSpec((1, C), lambda b, n: (0, 0)),       # invariant bias
            ],
            out_specs=pl.BlockSpec((1, tn, C), lambda b, n: (b, n, 0)),
        ),
        compiler_params=pltpu.CompilerParams(
            dimension_semantics=("parallel", "parallel"),
            vmem_limit_bytes=vmem_limit_bytes),
    )(ctx, wp_t, bp_2d)

    return out


# -----------------------------------------------------------------------------
# Pure-JAX reference matching the PyTorch forward exactly.
# -----------------------------------------------------------------------------
def attention_ref(x, wq, wk, wv, wp, bp, *, num_heads, qk_scale=None):
    B, N, C = x.shape
    H = num_heads
    D = C // H
    scale = qk_scale if qk_scale is not None else D ** (-0.5)
    hi = jax.lax.Precision.HIGHEST

    def lin(z, w, b=None):
        y = jnp.einsum('bnc,oc->bno', z, w, precision=hi)
        return y if b is None else y + b

    q = lin(x, wq).reshape(B, N, H, D).transpose(0, 2, 1, 3)
    k = lin(x, wk).reshape(B, N, H, D).transpose(0, 2, 1, 3)
    v = lin(x, wv).reshape(B, N, H, D).transpose(0, 2, 1, 3)
    attn = jnp.einsum('bhqd,bhkd->bhqk', q, k, precision=hi) * scale
    attn = jax.nn.softmax(attn, axis=-1)
    out = jnp.einsum('bhqk,bhkd->bhqd', attn, v,
                     precision=hi).transpose(0, 2, 1, 3).reshape(B, N, C)
    return lin(out, wp, bp)


if __name__ == "__main__":
    root = jax.random.PRNGKey(0)

    def run_case(B, N, C, H, blocks):
        keys = jax.random.split(jax.random.fold_in(root, 1000 * C + H), 6)
        x = jax.random.normal(keys[0], (B, N, C), dtype=jnp.float32)
        # torch.nn.Linear weight layout: (out_features, in_features)
        wq = jax.random.normal(keys[1], (C, C), dtype=jnp.float32) * 0.05
        wk = jax.random.normal(keys[2], (C, C), dtype=jnp.float32) * 0.05
        wv = jax.random.normal(keys[3], (C, C), dtype=jnp.float32) * 0.05
        wp = jax.random.normal(keys[4], (C, C), dtype=jnp.float32) * 0.05
        bp = jax.random.normal(keys[5], (C,), dtype=jnp.float32) * 0.05

        out = attention_pallas(x, wq, wk, wv, wp, bp, num_heads=H,
                               block_n=blocks, block_q=blocks, block_kv=blocks)
        out = jax.block_until_ready(out)

        ref = attention_ref(x, wq, wk, wv, wp, bp, num_heads=H)
        assert out.shape == (B, N, C)
        err = jnp.max(jnp.abs(out - ref))
        assert jnp.allclose(out, ref, atol=5e-3, rtol=5e-3), (
            f"max abs err = {err} (B={B} N={N} C={C} H={H})")

    # Case 1: head_dim = 128 -> group size 1 (fully lane-aligned head slices,
    # no in-kernel slicing at all).  Small blocks so the seq/q/kv grid axes and
    # the online-softmax accumulation across kv tiles are actually exercised.
    run_case(B=2, N=128, C=256, H=2, blocks=64)

    # Case 2: head_dim = 64 (typical ViT) -> two heads per 128-lane block.
    run_case(B=2, N=128, C=256, H=4, blocks=64)

    print("KERNEL_OK")
</pallas_src>

<mosaic_0001>
module attributes {stable_mosaic.version = 11 : i64} {
  func.func @_qkv_proj_kernel(%arg0: i32, %arg1: i32, %arg2: memref<1x64x256xf32, #tpu.memory_space<vmem>>, %arg3: memref<256x768xf32, #tpu.memory_space<vmem>>, %arg4: memref<1x64x768xf32, #tpu.memory_space<vmem>>) attributes {dimension_semantics = [#tpu.dimension_semantics<parallel>, #tpu.dimension_semantics<parallel>], iteration_bounds = array<i64: 2, 2>, scalar_prefetch = 0 : i64, scratch_operands = 0 : i64, tpu.core_type = #tpu.core_type<tc>, window_params = [{transform_indices = @transform_0, window_bounds = array<i64: 1, 64, 256>}, {pipeline_mode = #tpu.pipeline_mode<synchronous>, transform_indices = @transform_1, window_bounds = array<i64: 256, 768>}, {transform_indices = @transform_2, window_bounds = array<i64: 1, 64, 768>}]} {
    %c0 = arith.constant 0 : index
    %c0_0 = arith.constant 0 : index
    %c0_1 = arith.constant 0 : index
    %0 = vector.load %arg2[%c0, %c0_0, %c0_1] : memref<1x64x256xf32, #tpu.memory_space<vmem>>, vector<1x64x256xf32>
    %1 = vector.shape_cast %0 : vector<1x64x256xf32> to vector<64x256xf32>
    %c0_2 = arith.constant 0 : index
    %c0_3 = arith.constant 0 : index
    %2 = vector.load %arg3[%c0_2, %c0_3] : memref<256x768xf32, #tpu.memory_space<vmem>>, vector<256x768xf32>
    %cst = arith.constant dense<0.000000e+00> : vector<64x768xf32>
    %3 = tpu.matmul %1, %2, %cst {dimension_numbers = #tpu.dot_dimension_numbers<[1], [0], [0], [1], [0, 0, 1, 1], [], []>} : vector<64x256xf32>, vector<256x768xf32>, vector<64x768xf32> -> vector<64x768xf32>
    %c0_4 = arith.constant 0 : index
    %c0_5 = arith.constant 0 : index
    %c0_6 = arith.constant 0 : index
    %4 = vector.load %arg4[%c0_4, %c0_5, %c0_6] : memref<1x64x768xf32, #tpu.memory_space<vmem>>, vector<1x64x768xf32>
    %5 = vector.shape_cast %4 : vector<1x64x768xf32> to vector<64x768xf32>
    %6 = vector.shape_cast %3 : vector<64x768xf32> to vector<1x64x768xf32>
    tpu.vector_store %arg4[%c0_4, %c0_5, %c0_6], %6 {strides = array<i32>} : memref<1x64x768xf32, #tpu.memory_space<vmem>>, vector<1x64x768xf32>,
    return
  }
  func.func @transform_0(%arg0: i32, %arg1: i32) -> (i32, i32, i32) {
    %c0_i32 = arith.constant 0 : i32
    %c0_i32_0 = arith.constant 0 : i32
    return %arg0, %arg1, %c0_i32 : i32, i32, i32
  }
  func.func @transform_1(%arg0: i32, %arg1: i32) -> (i32, i32) {
    %c0_i32 = arith.constant 0 : i32
    %c0_i32_0 = arith.constant 0 : i32
    %c0_i32_1 = arith.constant 0 : i32
    return %c0_i32, %c0_i32_0 : i32, i32
  }
  func.func @transform_2(%arg0: i32, %arg1: i32) -> (i32, i32, i32) {
    %c0_i32 = arith.constant 0 : i32
    %c0_i32_0 = arith.constant 0 : i32
    return %arg0, %arg1, %c0_i32 : i32, i32, i32
  }
}

</mosaic_0001>

<bundles_post_ra>
// kernel: tpu_custom_call.1
= control target key start
LH: loop header
LB: loop body
LE: loop exit
PB: predicated region body
PF: predicated region fallthrough
CT: control target
= control target key end

     0   :  { %s1743_s0 = inlined_call_operand.hbm [shape: f32[2,128,256], index: 0, kind: input, shape index: {}]   ;;  %s1744_s1 = inlined_call_operand.hbm [shape: f32[256,768], index: 1, kind: input, shape index: {}]   ;;  %s1745_s2 = inlined_call_operand.hbm [shape: f32[2,128,768], index: 2, kind: output, shape index: {}]  }
   0x1   :  { %1750 = sst [smem:[#allocation15_spill]] %s1744_s1 }
   0x2   :  { %7 = vsyncpa [#allocation3], 0 }
   0x3   :  { %9 = vsyncpa [#allocation3 + $0x1], 0 }
   0x4   :  { %10 = vsyncpa [#allocation6], 0 }
   0x5   :  { %11 = vsyncpa [#allocation4], 0 }
   0x6   :  { %13 = vsyncpa [#allocation4 + $0x1], 0  ;;  %s1372_s9 = smov 0   ;;  %s1374_s10 = smov 0  }
   0x7   :  { %s1376_s11 = smov 0   ;;  %s1378_s12 = smov 0  }
   0x8   :  { %s1380_s13 = smov 0   ;;  %s1382_s14 = smov 0  }
   0x9   :  { %s1384_s15 = smov 0   ;;  %s1386_s16 = smov 0  }
   0xa LB: > { %1751 = sst [smem:[#allocation11_spill]] %s1320_s9  ;;  %s1069_s17 = sadd.s32 4294967295, %s1348_s16   ;;  %s1348_s16 = sphi %s1386_s16, %s19_s16   ;;  %s1344_s15 = sphi %s1384_s15, %s1771_s15   ;;  %s1340_s14 = sphi %s1382_s14, %s1766_s14   ;;  %s1336_s13 = sphi %s1380_s13, %s1770_s13   ;;  %s1332_s12 = sphi %s1378_s12, %s1765_s12   ;;  %s1328_s11 = sphi %s1376_s11, %s1769_s11   ;;  %s1324_s10 = sphi %s1374_s10, %s1768_s10   ;;  %s1320_s9 = sphi %s1372_s9, %s1767_s9  }
   0xb   : > { %1752 = sst [smem:[#allocation12_spill]] %s1340_s14  ;;  %s1070_s18 = sadd.s32 4294967294, %s1348_s16  }
   0xc   : > { %p53_p0 = scmp.ne.s32.totalorder %s1324_s10, %s1320_s9  ;;  %p1416_p1 = scmp.eq.s32.totalorder %s1069_s17, 0 }
   0xd   : > { %p1420_p2 = scmp.eq.s32.totalorder %s1069_s17, 3  ;;  %p106_p3 = scmp.eq.s32.totalorder %s1070_s18, 3 }
   0xe   : > { %p1426_p4 = por %p1416_p1, %p53_p0  ;;  %p1071_p5 = scmp.ge.s32.totalorder %s1348_s16, 1 }
   0xf   : > { %p1431_p6 = por %p106_p3, %p53_p0  ;;  %p113_p7 = scmp.lt.s32.totalorder %s1348_s16, 5 }
  0x10   : > { %s1758_s1 = sld [smem:[#allocation15_spill]]  ;;  %s1350_s27 = smov [#allocation5]  }
  0x11   : > { %s1756_s22 = scalar_select %p1431_p6, 1, 0 }
  0x12   : > { %p1439_p8 = pnand %p1071_p5, %p113_p7  ;;  %s126_s28 = sshll.u32 %s1350_s27, 4  ;;  %s127_s28 = int_to_ptr.vmem [resolvable:$true] %s126_s28 }
  0x13   : > { %1757 = sst [smem:[#allocation13_spill]] %s1756_s22  ;;  %s1351_s29 = smov 768  }
  0x14   : > { %p1099_p9 = pneg %p1439_p8  ;;  %s1352_s30 = smov 48  }
  0x15   : > { %s28_s3 = sadd.s32 1, %s1340_s14  ;;  %s31_s4 = sadd.s32 1, %s1344_s15 }
  0x16   : > { %s124_s25 = sshll.u32 %s1758_s1, 4  ;;  %p1100_p10 = pnand %p1099_p9, %p1416_p1  ;;  %s125_s25 = int_to_ptr.hbm [resolvable:$true] %s124_s25 }
  0x17   : > { %p29_p11 = scmp.ge.s32.totalorder %s28_s3, 2  ;;  %s40_s5 = sadd.s32 1, %s1328_s11 }
  0x18   : > { %1102 = dma.hbm_to_vmem [thread:$0]  (!%p1100_p10), %s125_s25, 24576, %s127_s28, [#allocation6], %s1351_s29, %s1351_s29, %s1352_s30  }
  0x19   : > { %p47_p12 = scmp.ne.s32.totalorder %s1328_s11, %s1324_s10  ;;  %s1773_s3 = smov (%p29_p11, %s28_s3), 0 }
  0x1a   : > { %1760 = sst [smem:[#allocation14_spill]] %s1773_s3  ;;  %s1775_s4 = smov (!%p29_p11, %s31_s4), %s1344_s15 }
  0x1b   : > { %s36_s6 = ssub.s32 %s1340_s14, %s1773_s3  ;;  %p48_p13 = scmp.eq.s32.totalorder %s1348_s16, 0 }
  0x1c   : > { %p33_p0 = scmp.ge.s32.totalorder %s1775_s4, 2  ;;  %p1460_p3 = por %p1420_p2, %p47_p12 }
  0x1d   : > { %p1464_p5 = por %p48_p13, %p47_p12  ;;  %p1112_p7 = scmp.lt.s32.totalorder %s1348_s16, 4 }
  0x1e   : > { %s1777_s4 = smov (%p33_p0, %s1775_s4), 0  ;;  %s140_s17 = sand.u32 1, %s1328_s11  }
  0x1f   : > { %s1087_s18 = sshll.u32 %s1340_s14, 4  ;;  %s35_s23 = ssub.s32 %s1344_s15, %s1777_s4 }
  0x20   : > { %s37_s24 = sor.u32 %s36_s6, %s35_s23  ;;  %s1074_s25 = sshll.u32 %s140_s17, 7 }
  0x21   : > { %p38_p9 = scmp.eq.s32.totalorder %s37_s24, 0  ;;  %s1077_s20 = sshll.u32 %s1344_s15, 5 }
  0x22   : > { %s144_s27 = scalar_lea.vmem [#allocation2], %s1074_s25  ;;  %s150_s30 = sadd.s32 %s1087_s18, %s1077_s20 }
  0x23   : > { %s155_s28 = sshll.u32 %s144_s27, 4  ;;  %s1078_s1 = sshll.u32 %s150_s30, 3  ;;  %s156_s28 = int_to_ptr.vmem [resolvable:$true] %s155_s28 }
  0x24   : > { %s1477_s29 = scalar_select %p38_p9, %s1328_s11, %s40_s5  }
  0x25   : > { %p1104_p2 = pnand %p1112_p7, %p1464_p5  ;;  %s152_s9 = scalar_lea.hbm %s1743_s0, %s1078_s1 }
  0x26   : > { %s153_s14 = sshll.u32 %s152_s9, 4  ;;  %s141_s6 = scalar_lea.sflag [#allocation3], %s140_s17  ;;  %s154_s14 = int_to_ptr.hbm [resolvable:$true] %s153_s14 }
  0x27   : > { %s1353_s23 = smov 256   ;;  %s1354_s24 = smov 16  }
  0x28   : > { %1106 = dma.hbm_to_vmem [thread:$0]  (!%p1104_p2), %s154_s14, 2048, %s156_s28, %s141_s6, %s1353_s23, %s1353_s23, %s1354_s24  }
  0x29   : > { %167 = sbr.rel (%p1439_p8) target bundleno = 404 (0x194), region = 28  ;;  %s1489_s5 = sand.u32 (!%p1439_p8), 1, %s1324_s10  }
  0x2a   : > { %s1080_s8 = sshll.u32 (!%p1439_p8), %s1489_s5, 7  ;;  %s170_s18 = scalar_lea.sflag (!%p1439_p8), [#allocation3], %s1489_s5 }
  0x2b   : > { %s1493_s25 = scalar_lea.vmem (!%p1439_p8), [#allocation2], %s1080_s8 }
  0x2e   : > { %1307 = dma.done.wait (%p1426_p4), %s170_s18, 2048  }
  0x2f   : > { %1309 = vsyncadd (%p1426_p4), %s170_s18, 4294965248 }
  0x30   : > { %1311 = dma.done.wait (%p1416_p1), [#allocation6], 24576  }
  0x31   : > { %1313 = vsyncadd (%p1416_p1), [#allocation6], 4294942720  ;;  %v309_v0 = vld [vmem:[#allocation5 + $0x2d8] sm:$0xff]  ;;  %v303_v2 = vld [vmem:[#allocation5 + $0x2a8] sm:$0xff]  ;;  %s1088_s1 = smul.u32 384, %s1489_s5  ;;  %s951_s20 = scalar_lea.sflag [#allocation4], %s1489_s5 }
  0x32   : > { %v405_v1 = vld [vmem:[#allocation5 + $0x5d8] sm:$0xff]  ;;  %492 = vmatpush.msra.mxu2 %v309_v0  ;;  %v399_v3 = vld [vmem:[#allocation5 + $0x5a8] sm:$0xff]  ;;  %v308_v6 = vld [vmem:[#allocation5 + $0x2d0] sm:$0xff]  ;;  %s1089_s14 = smul.u32 48, %s1332_s12  ;;  %s1266_s23 = scalar_lea.hbm %s1745_s2, 1536 }
  0x33   : > { %533 = vmatpush.msra.mxu3 %v405_v1  ;;  %v297_v4 = vld [vmem:[#allocation5 + $0x278] sm:$0xff]  ;;  %v404_v7 = vld [vmem:[#allocation5 + $0x5d0] sm:$0xff]  ;;  %v302_v8 = vld [vmem:[#allocation5 + $0x2a0] sm:$0xff]  ;;  %410 = vmatpush.msra.mxu0 %v308_v6  ;;  %s1618_s9 = scalar_lea.vmem [#allocation7], %s1088_s1  ;;  %s1090_s19 = smul.u32 96, %s1336_s13 }
  0x34   : > { %v393_v5 = vld [vmem:[#allocation5 + $0x578] sm:$0xff]  ;;  %493 = vmatpush.msra.mxu2 %v303_v2  ;;  %v398_v9 = vld [vmem:[#allocation5 + $0x5a0] sm:$0xff]  ;;  %451 = vmatpush.msra.mxu1 %v404_v7  ;;  %v291_v10 = vld [vmem:[#allocation5 + $0x248] sm:$0xff]  ;;  %s966_s13 = sshll.u32 %s1618_s9, 4  ;;  %s967_s13 = int_to_ptr.vmem [resolvable:$true] %s966_s13 }
  0x35   : > { %534 = vmatpush.msra.mxu3 %v399_v3  ;;  %v387_v11 = vld [vmem:[#allocation5 + $0x548] sm:$0xff]  ;;  %v296_v12 = vld [vmem:[#allocation5 + $0x270] sm:$0xff]  ;;  %411 = vmatpush.msra.mxu0 %v302_v8  ;;  %v285_v14 = vld [vmem:[#allocation5 + $0x218] sm:$0xff]  ;;  %s963_s21 = sadd.s32 %s1090_s19, %s1089_s14 }
  0x36   : > { %494 = vmatpush.msra.mxu2 %v297_v4  ;;  %v392_v13 = vld [vmem:[#allocation5 + $0x570] sm:$0xff]  ;;  %452 = vmatpush.msra.mxu1 %v398_v9  ;;  %v381_v15 = vld [vmem:[#allocation5 + $0x518] sm:$0xff]  ;;  %v290_v16 = vld [vmem:[#allocation5 + $0x240] sm:$0xff]  ;;  %s1084_s22 = sshll.u32 %s963_s21, 3 }
  0x37   : > { %535 = vmatpush.msra.mxu3 %v393_v5  ;;  %v386_v17 = vld [vmem:[#allocation5 + $0x540] sm:$0xff]  ;;  %412 = vmatpush.msra.mxu0 %v296_v12  ;;  %v279_v18 = vld [vmem:[#allocation5 + $0x1e8] sm:$0xff]  ;;  %v284_v20 = vld [vmem:[#allocation5 + $0x210] sm:$0xff]  ;;  %s965_s3 = scalar_lea.hbm %s1745_s2, %s1084_s22 }
  0x38   : > { %495 = vmatpush.msra.mxu2 %v291_v10  ;;  %453 = vmatpush.msra.mxu1 %v392_v13  ;;  %v375_v19 = vld [vmem:[#allocation5 + $0x4e8] sm:$0xff]  ;;  %v380_v21 = vld [vmem:[#allocation5 + $0x510] sm:$0xff]  ;;  %v273_v22 = vld [vmem:[#allocation5 + $0x1b8] sm:$0xff]  ;;  %s968_s17 = sshll.u32 %s965_s3, 4  ;;  %s969_s17 = int_to_ptr.hbm [resolvable:$true] %s968_s17 }
  0x39   : > { %536 = vmatpush.msra.mxu3 %v387_v11  ;;  %413 = vmatpush.msra.mxu0 %v290_v16  ;;  %v369_v23 = vld [vmem:[#allocation5 + $0x4b8] sm:$0xff]  ;;  %v278_v24 = vld [vmem:[#allocation5 + $0x1e0] sm:$0xff]  ;;  %v267_v26 = vld [vmem:[#allocation5 + $0x188] sm:$0xff]  ;;  %s1260_s27 = sshra.s32 %s969_s17, 4  ;;  %s1261_s27 = int_to_ptr.hbm [resolvable:$true] %s1260_s27 }
  0x3a   : > { %496 = vmatpush.msra.mxu2 %v285_v14  ;;  %454 = vmatpush.msra.mxu1 %v386_v17  ;;  %v374_v25 = vld [vmem:[#allocation5 + $0x4e0] sm:$0xff]  ;;  %v363_v27 = vld [vmem:[#allocation5 + $0x488] sm:$0xff]  ;;  %v272_v28 = vld [vmem:[#allocation5 + $0x1b0] sm:$0xff]  ;;  %s1262_s28 = scalar_lea.hbm %s1261_s27, 384  ;;  %p1267_p10 = scmp.lt.s32.totalorder %s1261_s27, %s1745_s2 }
  0x3b   : > { %537 = vmatpush.msra.mxu3 %v381_v15  ;;  %414 = vmatpush.msra.mxu0 %v284_v20  ;;  %v368_v29 = vld [vmem:[#allocation5 + $0x4b0] sm:$0xff]  ;;  %v261_v30 = vld [vmem:[#allocation5 + $0x158] sm:$0xff]  ;;  %v266_v32 = vld [vmem:[#allocation5 + $0x180] sm:$0xff]  ;;  %p1263_p1 = scmp.ne.s32.totalorder %s1261_s27, %s1262_s28  ;;  %p1268_p11 = scmp.lt.s32.totalorder %s1266_s23, %s1262_s28 }
  0x3c   : > { %497 = vmatpush.msra.mxu2 %v279_v18  ;;  %455 = vmatpush.msra.mxu1 %v380_v21  ;;  %v357_v31 = vld [vmem:[#allocation5 + $0x458] sm:$0xff]  ;;  %v362_v33 = vld [vmem:[#allocation5 + $0x480] sm:$0xff]  ;;  %v255_v34 = vld [vmem:[#allocation5 + $0x128] sm:$0xff] }
  0x3d   : > { %538 = vmatpush.msra.mxu3 %v375_v19  ;;  %415 = vmatpush.msra.mxu0 %v278_v24  ;;  %v351_v35 = vld [vmem:[#allocation5 + $0x428] sm:$0xff]  ;;  %v260_v36 = vld [vmem:[#allocation5 + $0x150] sm:$0xff]  ;;  %v249_v38 = vld [vmem:[#allocation5 + $0xf8] sm:$0xff]  ;;  %p1264_p4 = pnand %p1263_p1, %p1460_p3  ;;  %p1269_p12 = por %p1268_p11, %p1267_p10 }
  0x3e   : > { %498 = vmatpush.msra.mxu2 %v273_v22  ;;  %456 = vmatpush.msra.mxu1 %v374_v25  ;;  %v356_v37 = vld [vmem:[#allocation5 + $0x450] sm:$0xff]  ;;  %v345_v39 = vld [vmem:[#allocation5 + $0x3f8] sm:$0xff]  ;;  %v254_v40 = vld [vmem:[#allocation5 + $0x120] sm:$0xff] }
  0x3f   : > { %539 = vmatpush.msra.mxu3 %v369_v23  ;;  %416 = vmatpush.msra.mxu0 %v272_v28  ;;  %v350_v41 = vld [vmem:[#allocation5 + $0x420] sm:$0xff]  ;;  %v243_v42 = vld [vmem:[#allocation5 + $0xc8] sm:$0xff]  ;;  %v248_v44 = vld [vmem:[#allocation5 + $0xf0] sm:$0xff]  ;;  %p1265_p8 = pneg %p1264_p4 }
  0x40   : > { %499 = vmatpush.msra.mxu2 %v267_v26  ;;  %457 = vmatpush.msra.mxu1 %v368_v29  ;;  %v339_v43 = vld [vmem:[#allocation5 + $0x3c8] sm:$0xff]  ;;  %v344_v45 = vld [vmem:[#allocation5 + $0x3f0] sm:$0xff]  ;;  %v237_v46 = vld [vmem:[#allocation5 + $0x98] sm:$0xff] }
  0x41   : > { %540 = vmatpush.msra.mxu3 %v363_v27  ;;  %417 = vmatpush.msra.mxu0 %v266_v32  ;;  %v333_v47 = vld [vmem:[#allocation5 + $0x398] sm:$0xff]  ;;  %v242_v48 = vld [vmem:[#allocation5 + $0xc0] sm:$0xff]  ;;  %v231_v50 = vld [vmem:[#allocation5 + $0x68] sm:$0xff]  ;;  %p1270_p13 = pnand %p1269_p12, %p1265_p8 }
  0x42   : > { %500 = vmatpush.msra.mxu2 %v261_v30  ;;  %458 = vmatpush.msra.mxu1 %v362_v33  ;;  %v338_v49 = vld [vmem:[#allocation5 + $0x3c0] sm:$0xff]  ;;  %v327_v51 = vld [vmem:[#allocation5 + $0x368] sm:$0xff]  ;;  %v236_v52 = vld [vmem:[#allocation5 + $0x90] sm:$0xff] }
  0x43   : > { %541 = vmatpush.msra.mxu3 %v357_v31  ;;  %418 = vmatpush.msra.mxu0 %v260_v36  ;;  %v332_v53 = vld [vmem:[#allocation5 + $0x390] sm:$0xff]  ;;  %v225_v54 = vld [vmem:[#allocation5 + $0x38] sm:$0xff]  ;;  %v230_v56 = vld [vmem:[#allocation5 + $0x60] sm:$0xff] }
  0x44   : > { %501 = vmatpush.msra.mxu2 %v255_v34  ;;  %459 = vmatpush.msra.mxu1 %v356_v37  ;;  %v321_v55 = vld [vmem:[#allocation5 + $0x338] sm:$0xff]  ;;  %v326_v57 = vld [vmem:[#allocation5 + $0x360] sm:$0xff]  ;;  %v219_v58 = vld [vmem:[#allocation5 + $0x8] sm:$0xff] }
  0x45   : > { %542 = vmatpush.msra.mxu3 %v351_v35  ;;  %419 = vmatpush.msra.mxu0 %v254_v40  ;;  %v315_v59 = vld [vmem:[#allocation5 + $0x308] sm:$0xff]  ;;  %v1504_v60 = vld [vmem:[%s1493_s25] sm:$0xff]  ;;  %v224_v0 = vld [vmem:[#allocation5 + $0x30] sm:$0xff] }
  0x46   : > { %502 = vmatpush.msra.mxu2 %v249_v38  ;;  %460 = vmatpush.msra.mxu1 %v350_v41  ;;  %v1507_v61 = vld [vmem:[%s1493_s25 + $0x8] sm:$0xff]  ;;  %v320_v1 = vld [vmem:[#allocation5 + $0x330] sm:$0xff]  ;;  %v305_v2 = vld [vmem:[#allocation5 + $0x2b8] sm:$0xff] }
  0x47   : > { %543 = vmatpush.msra.mxu3 %v345_v39  ;;  %420 = vmatpush.msra.mxu0 %v248_v44  ;;  %v311_v62 = vld [vmem:[#allocation5 + $0x2e8] sm:$0xff]  ;;  %v401_v3 = vld [vmem:[#allocation5 + $0x5b8] sm:$0xff]  ;;  %v218_v4 = vld [vmem:[#allocation5] sm:$0xff] }
  0x48   : > { %503 = vmatpush.msra.mxu2 %v243_v42  ;;  %461 = vmatpush.msra.mxu1 %v344_v45  ;;  %v407_v63 = vld [vmem:[#allocation5 + $0x5e8] sm:$0xff]  ;;  %v314_v5 = vld [vmem:[#allocation5 + $0x300] sm:$0xff]  ;;  %v1514_v10 = vld [vmem:[%s1493_s25 + $0x10] sm:$0xff] }
  0x49   : > { %544 = vmatpush.msra.mxu3 %v339_v43  ;;  %421 = vmatpush.msra.mxu0 %v242_v48  ;;  %v310_v6 = vld [vmem:[#allocation5 + $0x2e0] sm:$0xff]  ;;  %v299_v8 = vld [vmem:[#allocation5 + $0x288] sm:$0xff]  ;;  %v1517_v11 = vld [vmem:[%s1493_s25 + $0x18] sm:$0xff] }
  0x4a   : > { %504 = vmatpush.msra.mxu2 %v237_v46  ;;  %462 = vmatpush.msra.mxu1 %v338_v49  ;;  %v406_v7 = vld [vmem:[#allocation5 + $0x5e0] sm:$0xff]  ;;  %v395_v9 = vld [vmem:[#allocation5 + $0x588] sm:$0xff]  ;;  %v304_v12 = vld [vmem:[#allocation5 + $0x2b0] sm:$0xff] }
  0x4b   : > { %545 = vmatpush.msra.mxu3 %v333_v47  ;;  %422 = vmatpush.msra.mxu0 %v236_v52  ;;  %v400_v13 = vld [vmem:[#allocation5 + $0x5b0] sm:$0xff]  ;;  %v293_v14 = vld [vmem:[#allocation5 + $0x258] sm:$0xff]  ;;  %v298_v16 = vld [vmem:[#allocation5 + $0x280] sm:$0xff] }
  0x4c   : > { %505 = vmatpush.msra.mxu2 %v231_v50  ;;  %463 = vmatpush.msra.mxu1 %v332_v53  ;;  %v389_v15 = vld [vmem:[#allocation5 + $0x558] sm:$0xff]  ;;  %v394_v17 = vld [vmem:[#allocation5 + $0x580] sm:$0xff]  ;;  %v287_v18 = vld [vmem:[#allocation5 + $0x228] sm:$0xff] }
  0x4d   : > { %546 = vmatpush.msra.mxu3 %v327_v51  ;;  %423 = vmatpush.msra.mxu0 %v230_v56  ;;  %v383_v19 = vld [vmem:[#allocation5 + $0x528] sm:$0xff]  ;;  %v292_v20 = vld [vmem:[#allocation5 + $0x250] sm:$0xff]  ;;  %v281_v22 = vld [vmem:[#allocation5 + $0x1f8] sm:$0xff] }
  0x4e   : > { %506 = vmatpush.msra.mxu2 %v225_v54  ;;  %464 = vmatpush.msra.mxu1 %v326_v57  ;;  %v388_v21 = vld [vmem:[#allocation5 + $0x550] sm:$0xff]  ;;  %v377_v23 = vld [vmem:[#allocation5 + $0x4f8] sm:$0xff]  ;;  %v1524_v24 = vld [vmem:[%s1493_s25 + $0x20] sm:$0xff] }
  0x4f   : > { %547 = vmatpush.msra.mxu3 %v321_v55  ;;  %424 = vmatpush.msra.mxu0 %v224_v0  ;;  %v1527_v25 = vld [vmem:[%s1493_s25 + $0x28] sm:$0xff]  ;;  %v286_v26 = vld [vmem:[#allocation5 + $0x220] sm:$0xff]  ;;  %v280_v30 = vld [vmem:[#allocation5 + $0x1f0] sm:$0xff] }
  0x50   : > { %507 = vmatpush.msra.mxu2 %v219_v58  ;;  %465 = vmatpush.msra.mxu1 %v320_v1  ;;  %v382_v27 = vld [vmem:[#allocation5 + $0x520] sm:$0xff]  ;;  %v275_v28 = vld [vmem:[#allocation5 + $0x1c8] sm:$0xff]  ;;  %v376_v31 = vld [vmem:[#allocation5 + $0x4f0] sm:$0xff] }
  0x51   : > { %548 = vmatpush.msra.mxu3 %v315_v59  ;;  %508 = vmatmul.f32.vlgmr.msra.gmra.mxu2 %v1504_v60  ;;  %v371_v29 = vld [vmem:[#allocation5 + $0x4c8] sm:$0xff]  ;;  %v269_v32 = vld [vmem:[#allocation5 + $0x198] sm:$0xff]  ;;  %v274_v34 = vld [vmem:[#allocation5 + $0x1c0] sm:$0xff] }
  0x52   : > { %549 = vmatmul.f32.vlgmr.msra.gmra.mxu3 %v1507_v61  ;;  %656 = vmatpush.msrb.mxu2 %v311_v62  ;;  %v365_v33 = vld [vmem:[#allocation5 + $0x498] sm:$0xff]  ;;  %v370_v35 = vld [vmem:[#allocation5 + $0x4c0] sm:$0xff]  ;;  %v263_v36 = vld [vmem:[#allocation5 + $0x168] sm:$0xff] }
  0x53   : > { %697 = vmatpush.msrb.mxu3 %v407_v63  ;;  %425 = vmatpush.msra.mxu0 %v218_v4  ;;  %v359_v37 = vld [vmem:[#allocation5 + $0x468] sm:$0xff]  ;;  %v1534_v38 = vld [vmem:[%s1493_s25 + $0x30] sm:$0xff]  ;;  %v1537_v39 = vld [vmem:[%s1493_s25 + $0x38] sm:$0xff] }
  0x54   : > { %657 = vmatpush.msrb.mxu2 %v305_v2  ;;  %466 = vmatpush.msra.mxu1 %v314_v5  ;;  %v268_v40 = vld [vmem:[#allocation5 + $0x190] sm:$0xff]  ;;  %v257_v42 = vld [vmem:[#allocation5 + $0x138] sm:$0xff]  ;;  %v262_v44 = vld [vmem:[#allocation5 + $0x160] sm:$0xff] }
  0x55   : > { %698 = vmatpush.msrb.mxu3 %v401_v3  ;;  %426 = vmatmul.f32.vlgmr.msra.gmra.mxu0 %v1504_v60  ;;  %v364_v41 = vld [vmem:[#allocation5 + $0x490] sm:$0xff]  ;;  %v353_v43 = vld [vmem:[#allocation5 + $0x438] sm:$0xff]  ;;  %v358_v45 = vld [vmem:[#allocation5 + $0x460] sm:$0xff] }
  0x56   : > { %467 = vmatmul.f32.vlgmr.msra.gmra.mxu1 %v1507_v61  ;;  %574 = vmatpush.msrb.mxu0 %v310_v6  ;;  %v251_v46 = vld [vmem:[#allocation5 + $0x108] sm:$0xff]  ;;  %v256_v48 = vld [vmem:[#allocation5 + $0x130] sm:$0xff]  ;;  %v245_v50 = vld [vmem:[#allocation5 + $0xd8] sm:$0xff] }
  0x57   : > { %615 = vmatpush.msrb.mxu1 %v406_v7  ;;  %658 = vmatpush.msrb.mxu2 %v299_v8  ;;  %v347_v47 = vld [vmem:[#allocation5 + $0x408] sm:$0xff]  ;;  %v352_v49 = vld [vmem:[#allocation5 + $0x430] sm:$0xff]  ;;  %v341_v51 = vld [vmem:[#allocation5 + $0x3d8] sm:$0xff] }
  0x58   : > { %699 = vmatpush.msrb.mxu3 %v395_v9  ;;  %575 = vmatpush.msrb.mxu0 %v304_v12  ;;  %v1544_v52 = vld [vmem:[%s1493_s25 + $0x40] sm:$0xff]  ;;  %v1547_v53 = vld [vmem:[%s1493_s25 + $0x48] sm:$0xff]  ;;  %v244_v58 = vld [vmem:[#allocation5 + $0xd0] sm:$0xff] }
  0x59   : > { %511 = vmatmul.f32.gmra.mxu2 %v1514_v10  ;;  %616 = vmatpush.msrb.mxu1 %v400_v13  ;;  %v250_v54 = vld [vmem:[#allocation5 + $0x100] sm:$0xff]  ;;  %v239_v56 = vld [vmem:[#allocation5 + $0xa8] sm:$0xff]  ;;  %v340_v59 = vld [vmem:[#allocation5 + $0x3d0] sm:$0xff] }
  0x5a   : > { %552 = vmatmul.f32.gmra.mxu3 %v1517_v11  ;;  %659 = vmatpush.msrb.mxu2 %v293_v14  ;;  %v346_v55 = vld [vmem:[#allocation5 + $0x400] sm:$0xff]  ;;  %v335_v57 = vld [vmem:[#allocation5 + $0x3a8] sm:$0xff]  ;;  %v233_v62 = vld [vmem:[#allocation5 + $0x78] sm:$0xff] }
  0x5b   : > { %700 = vmatpush.msrb.mxu3 %v389_v15  ;;  %576 = vmatpush.msrb.mxu0 %v298_v16  ;;  %v329_v63 = vld [vmem:[#allocation5 + $0x378] sm:$0xff]  ;;  %v238_v0 = vld [vmem:[#allocation5 + $0xa0] sm:$0xff]  ;;  %v227_v2 = vld [vmem:[#allocation5 + $0x48] sm:$0xff] }
  0x5c   : > { %617 = vmatpush.msrb.mxu1 %v394_v17  ;;  %660 = vmatpush.msrb.mxu2 %v287_v18  ;;  %v334_v1 = vld [vmem:[#allocation5 + $0x3a0] sm:$0xff]  ;;  %v323_v3 = vld [vmem:[#allocation5 + $0x348] sm:$0xff]  ;;  %v1554_v4 = vld [vmem:[%s1493_s25 + $0x50] sm:$0xff] }
  0x5d   : > { %701 = vmatpush.msrb.mxu3 %v383_v19  ;;  %429 = vmatmul.f32.gmra.mxu0 %v1514_v10  ;;  %v1557_v5 = vld [vmem:[%s1493_s25 + $0x58] sm:$0xff]  ;;  %v232_v6 = vld [vmem:[#allocation5 + $0x70] sm:$0xff]  ;;  %v226_v12 = vld [vmem:[#allocation5 + $0x40] sm:$0xff] }
  0x5e   : > { %470 = vmatmul.f32.gmra.mxu1 %v1517_v11  ;;  %577 = vmatpush.msrb.mxu0 %v292_v20  ;;  %v328_v7 = vld [vmem:[#allocation5 + $0x370] sm:$0xff]  ;;  %v221_v8 = vld [vmem:[#allocation5 + $0x18] sm:$0xff]  ;;  %v322_v13 = vld [vmem:[#allocation5 + $0x340] sm:$0xff] }
  0x5f   : > { %618 = vmatpush.msrb.mxu1 %v388_v21  ;;  %661 = vmatpush.msrb.mxu2 %v281_v22  ;;  %v317_v9 = vld [vmem:[#allocation5 + $0x318] sm:$0xff]  ;;  %v220_v16 = vld [vmem:[#allocation5 + $0x10] sm:$0xff]  ;;  %v307_v18 = vld [vmem:[#allocation5 + $0x2c8] sm:$0xff] }
  0x60   : > { %702 = vmatpush.msrb.mxu3 %v377_v23  ;;  %578 = vmatpush.msrb.mxu0 %v286_v26  ;;  %v313_v14 = vld [vmem:[#allocation5 + $0x2f8] sm:$0xff]  ;;  %v316_v17 = vld [vmem:[#allocation5 + $0x310] sm:$0xff]  ;;  %v403_v19 = vld [vmem:[#allocation5 + $0x5c8] sm:$0xff] }
  0x61   : > { %514 = vmatmul.f32.gmra.mxu2 %v1524_v24  ;;  %619 = vmatpush.msrb.mxu1 %v382_v27  ;;  %v409_v15 = vld [vmem:[#allocation5 + $0x5f8] sm:$0xff]  ;;  %v1564_v20 = vld [vmem:[%s1493_s25 + $0x60] sm:$0xff]  ;;  %v1567_v21 = vld [vmem:[%s1493_s25 + $0x68] sm:$0xff] }
  0x62   : > { %555 = vmatmul.f32.gmra.mxu3 %v1527_v25  ;;  %662 = vmatpush.msrb.mxu2 %v275_v28  ;;  %v312_v22 = vld [vmem:[#allocation5 + $0x2f0] sm:$0xff]  ;;  %v301_v26 = vld [vmem:[#allocation5 + $0x298] sm:$0xff]  ;;  %v306_v28 = vld [vmem:[#allocation5 + $0x2c0] sm:$0xff] }
  0x63   : > { %703 = vmatpush.msrb.mxu3 %v371_v29  ;;  %579 = vmatpush.msrb.mxu0 %v280_v30  ;;  %v408_v23 = vld [vmem:[#allocation5 + $0x5f0] sm:$0xff]  ;;  %v397_v27 = vld [vmem:[#allocation5 + $0x598] sm:$0xff]  ;;  %v402_v29 = vld [vmem:[#allocation5 + $0x5c0] sm:$0xff] }
  0x64   : > { %620 = vmatpush.msrb.mxu1 %v376_v31  ;;  %663 = vmatpush.msrb.mxu2 %v269_v32  ;;  %v295_v30 = vld [vmem:[#allocation5 + $0x268] sm:$0xff]  ;;  %v300_v32 = vld [vmem:[#allocation5 + $0x290] sm:$0xff] }
  0x65   : > { %704 = vmatpush.msrb.mxu3 %v365_v33  ;;  %432 = vmatmul.f32.gmra.mxu0 %v1524_v24  ;;  %v391_v31 = vld [vmem:[#allocation5 + $0x568] sm:$0xff]  ;;  %v396_v33 = vld [vmem:[#allocation5 + $0x590] sm:$0xff] }
  0x66   : > { %473 = vmatmul.f32.gmra.mxu1 %v1527_v25  ;;  %580 = vmatpush.msrb.mxu0 %v274_v34  ;;  %v289_v34 = vld [vmem:[#allocation5 + $0x238] sm:$0xff] }
  0x67   : > { %621 = vmatpush.msrb.mxu1 %v370_v35  ;;  %664 = vmatpush.msrb.mxu2 %v263_v36  ;;  %v385_v35 = vld [vmem:[#allocation5 + $0x538] sm:$0xff]  ;;  %v1574_v36 = vld [vmem:[%s1493_s25 + $0x70] sm:$0xff] }
  0x68   : > { %705 = vmatpush.msrb.mxu3 %v359_v37  ;;  %581 = vmatpush.msrb.mxu0 %v268_v40  ;;  %v1577_v37 = vld [vmem:[%s1493_s25 + $0x78] sm:$0xff]  ;;  %v294_v40 = vld [vmem:[#allocation5 + $0x260] sm:$0xff] }
  0x69   : > { %517 = vmatmul.f32.gmra.mxu2 %v1534_v38  ;;  %622 = vmatpush.msrb.mxu1 %v364_v41  ;;  %v390_v41 = vld [vmem:[#allocation5 + $0x560] sm:$0xff] }
  0x6a   : > { %558 = vmatmul.f32.gmra.mxu3 %v1537_v39  ;;  %665 = vmatpush.msrb.mxu2 %v257_v42  ;;  %v283_v42 = vld [vmem:[#allocation5 + $0x208] sm:$0xff] }
  0x6b   : > { %706 = vmatpush.msrb.mxu3 %v353_v43  ;;  %582 = vmatpush.msrb.mxu0 %v262_v44  ;;  %v379_v43 = vld [vmem:[#allocation5 + $0x508] sm:$0xff]  ;;  %v288_v44 = vld [vmem:[#allocation5 + $0x230] sm:$0xff] }
  0x6c   : > { %623 = vmatpush.msrb.mxu1 %v358_v45  ;;  %666 = vmatpush.msrb.mxu2 %v251_v46  ;;  %v384_v45 = vld [vmem:[#allocation5 + $0x530] sm:$0xff]  ;;  %v277_v46 = vld [vmem:[#allocation5 + $0x1d8] sm:$0xff] }
  0x6d   : > { %707 = vmatpush.msrb.mxu3 %v347_v47  ;;  %435 = vmatmul.f32.gmra.mxu0 %v1534_v38  ;;  %v373_v47 = vld [vmem:[#allocation5 + $0x4d8] sm:$0xff] }
  0x6e   : > { %476 = vmatmul.f32.gmra.mxu1 %v1537_v39  ;;  %583 = vmatpush.msrb.mxu0 %v256_v48  ;;  %v282_v48 = vld [vmem:[#allocation5 + $0x200] sm:$0xff] }
  0x6f   : > { %624 = vmatpush.msrb.mxu1 %v352_v49  ;;  %667 = vmatpush.msrb.mxu2 %v245_v50  ;;  %v378_v49 = vld [vmem:[#allocation5 + $0x500] sm:$0xff]  ;;  %v271_v50 = vld [vmem:[#allocation5 + $0x1a8] sm:$0xff] }
  0x70   : > { %708 = vmatpush.msrb.mxu3 %v341_v51  ;;  %584 = vmatpush.msrb.mxu0 %v250_v54  ;;  %v367_v51 = vld [vmem:[#allocation5 + $0x4a8] sm:$0xff]  ;;  %v276_v54 = vld [vmem:[#allocation5 + $0x1d0] sm:$0xff] }
  0x71   : > { %520 = vmatmul.f32.gmra.mxu2 %v1544_v52  ;;  %625 = vmatpush.msrb.mxu1 %v346_v55  ;;  %v372_v55 = vld [vmem:[#allocation5 + $0x4d0] sm:$0xff] }
  0x72   : > { %561 = vmatmul.f32.gmra.mxu3 %v1547_v53  ;;  %668 = vmatpush.msrb.mxu2 %v239_v56  ;;  %v265_v56 = vld [vmem:[#allocation5 + $0x178] sm:$0xff] }
  0x73   : > { %709 = vmatpush.msrb.mxu3 %v335_v57  ;;  %585 = vmatpush.msrb.mxu0 %v244_v58  ;;  %v361_v57 = vld [vmem:[#allocation5 + $0x478] sm:$0xff]  ;;  %v270_v58 = vld [vmem:[#allocation5 + $0x1a0] sm:$0xff] }
  0x74   : > { %626 = vmatpush.msrb.mxu1 %v340_v59  ;;  %669 = vmatpush.msrb.mxu2 %v233_v62  ;;  %v366_v59 = vld [vmem:[#allocation5 + $0x4a0] sm:$0xff]  ;;  %v259_v62 = vld [vmem:[#allocation5 + $0x148] sm:$0xff] }
  0x75   : > { %710 = vmatpush.msrb.mxu3 %v329_v63  ;;  %438 = vmatmul.f32.gmra.mxu0 %v1544_v52  ;;  %v355_v63 = vld [vmem:[#allocation5 + $0x448] sm:$0xff] }
  0x76   : > { %479 = vmatmul.f32.gmra.mxu1 %v1547_v53  ;;  %586 = vmatpush.msrb.mxu0 %v238_v0  ;;  %v264_v0 = vld [vmem:[#allocation5 + $0x170] sm:$0xff] }
  0x77   : > { %627 = vmatpush.msrb.mxu1 %v334_v1  ;;  %670 = vmatpush.msrb.mxu2 %v227_v2  ;;  %v360_v1 = vld [vmem:[#allocation5 + $0x470] sm:$0xff]  ;;  %v253_v2 = vld [vmem:[#allocation5 + $0x118] sm:$0xff] }
  0x78   : > { %711 = vmatpush.msrb.mxu3 %v323_v3  ;;  %587 = vmatpush.msrb.mxu0 %v232_v6  ;;  %v349_v3 = vld [vmem:[#allocation5 + $0x418] sm:$0xff]  ;;  %v258_v6 = vld [vmem:[#allocation5 + $0x140] sm:$0xff] }
  0x79   : > { %523 = vmatmul.f32.gmra.mxu2 %v1554_v4  ;;  %628 = vmatpush.msrb.mxu1 %v328_v7  ;;  %v354_v7 = vld [vmem:[#allocation5 + $0x440] sm:$0xff] }
  0x7a   : > { %564 = vmatmul.f32.gmra.mxu3 %v1557_v5  ;;  %671 = vmatpush.msrb.mxu2 %v221_v8  ;;  %v247_v8 = vld [vmem:[#allocation5 + $0xe8] sm:$0xff] }
  0x7b   : > { %712 = vmatpush.msrb.mxu3 %v317_v9  ;;  %588 = vmatpush.msrb.mxu0 %v226_v12  ;;  %v343_v9 = vld [vmem:[#allocation5 + $0x3e8] sm:$0xff]  ;;  %v252_v12 = vld [vmem:[#allocation5 + $0x110] sm:$0xff] }
  0x7c   : > { %629 = vmatpush.msrb.mxu1 %v322_v13  ;;  %820 = vmatpush.msra.mxu2 %v313_v14  ;;  %v348_v13 = vld [vmem:[#allocation5 + $0x410] sm:$0xff]  ;;  %v241_v14 = vld [vmem:[#allocation5 + $0xb8] sm:$0xff] }
  0x7d   : > { %861 = vmatpush.msra.mxu3 %v409_v15  ;;  %441 = vmatmul.f32.gmra.mxu0 %v1554_v4  ;;  %v337_v15 = vld [vmem:[#allocation5 + $0x3b8] sm:$0xff] }
  0x7e   : > { %482 = vmatmul.f32.gmra.mxu1 %v1557_v5  ;;  %589 = vmatpush.msrb.mxu0 %v220_v16  ;;  %v246_v16 = vld [vmem:[#allocation5 + $0xe0] sm:$0xff] }
  0x7f   : > { %630 = vmatpush.msrb.mxu1 %v316_v17  ;;  %821 = vmatpush.msra.mxu2 %v307_v18  ;;  %v342_v17 = vld [vmem:[#allocation5 + $0x3e0] sm:$0xff]  ;;  %v235_v18 = vld [vmem:[#allocation5 + $0x88] sm:$0xff] }
  0x80   : > { %862 = vmatpush.msra.mxu3 %v403_v19  ;;  %738 = vmatpush.msra.mxu0 %v312_v22  ;;  %v331_v19 = vld [vmem:[#allocation5 + $0x388] sm:$0xff]  ;;  %v240_v22 = vld [vmem:[#allocation5 + $0xb0] sm:$0xff] }
  0x81   : > { %526 = vmatmul.f32.gmra.mxu2 %v1564_v20  ;;  %779 = vmatpush.msra.mxu1 %v408_v23  ;;  %v336_v23 = vld [vmem:[#allocation5 + $0x3b0] sm:$0xff] }
  0x82   : > { %567 = vmatmul.f32.gmra.mxu3 %v1567_v21  ;;  %822 = vmatpush.msra.mxu2 %v301_v26  ;;  %v229_v26 = vld [vmem:[#allocation5 + $0x58] sm:$0xff] }
  0x83   : > { %863 = vmatpush.msra.mxu3 %v397_v27  ;;  %739 = vmatpush.msra.mxu0 %v306_v28  ;;  %v325_v27 = vld [vmem:[#allocation5 + $0x358] sm:$0xff]  ;;  %v234_v28 = vld [vmem:[#allocation5 + $0x80] sm:$0xff] }
  0x84   : > { %780 = vmatpush.msra.mxu1 %v402_v29  ;;  %823 = vmatpush.msra.mxu2 %v295_v30  ;;  %v330_v29 = vld [vmem:[#allocation5 + $0x380] sm:$0xff]  ;;  %v223_v30 = vld [vmem:[#allocation5 + $0x28] sm:$0xff] }
  0x85   : > { %864 = vmatpush.msra.mxu3 %v391_v31  ;;  %444 = vmatmul.f32.gmra.mxu0 %v1564_v20  ;;  %v319_v31 = vld [vmem:[#allocation5 + $0x328] sm:$0xff] }
  0x86   : > { %485 = vmatmul.f32.gmra.mxu1 %v1567_v21  ;;  %740 = vmatpush.msra.mxu0 %v300_v32  ;;  %v228_v32 = vld [vmem:[#allocation5 + $0x50] sm:$0xff] }
  0x87   : > { %781 = vmatpush.msra.mxu1 %v396_v33  ;;  %824 = vmatpush.msra.mxu2 %v289_v34  ;;  %v324_v33 = vld [vmem:[#allocation5 + $0x350] sm:$0xff]  ;;  %v222_v34 = vld [vmem:[#allocation5 + $0x20] sm:$0xff] }
  0x88   : > { %865 = vmatpush.msra.mxu3 %v385_v35  ;;  %741 = vmatpush.msra.mxu0 %v294_v40  ;;  %v318_v35 = vld [vmem:[#allocation5 + $0x320] sm:$0xff] }
  0x89   : > { %529 = vmatmul.f32.gmra.mxu2 %v1574_v36  ;;  %782 = vmatpush.msra.mxu1 %v390_v41 }
  0x8a   : > { %570 = vmatmul.f32.gmra.mxu3 %v1577_v37  ;;  %825 = vmatpush.msra.mxu2 %v283_v42 }
  0x8b   : > { %866 = vmatpush.msra.mxu3 %v379_v43  ;;  %742 = vmatpush.msra.mxu0 %v288_v44 }
  0x8c   : > { %783 = vmatpush.msra.mxu1 %v384_v45  ;;  %826 = vmatpush.msra.mxu2 %v277_v46 }
  0x8d   : > { %867 = vmatpush.msra.mxu3 %v373_v47  ;;  %447 = vmatmul.f32.gmra.mxu0 %v1574_v36 }
  0x8e   : > { %488 = vmatmul.f32.gmra.mxu1 %v1577_v37  ;;  %743 = vmatpush.msra.mxu0 %v282_v48 }
  0x8f   : > { %784 = vmatpush.msra.mxu1 %v378_v49  ;;  %827 = vmatpush.msra.mxu2 %v271_v50 }
  0x90   : > { %868 = vmatpush.msra.mxu3 %v367_v51  ;;  %744 = vmatpush.msra.mxu0 %v276_v54 }
  0x91   : > { %672 = vmatmul.f32.vlgmr.msrb.gmra.mxu2 %v1504_v60  ;;  %785 = vmatpush.msra.mxu1 %v372_v55 }
  0x92   : > { %713 = vmatmul.f32.vlgmr.msrb.gmra.mxu3 %v1507_v61  ;;  %828 = vmatpush.msra.mxu2 %v265_v56 }
  0x93   : > { %869 = vmatpush.msra.mxu3 %v361_v57  ;;  %745 = vmatpush.msra.mxu0 %v270_v58 }
  0x94   : > { %786 = vmatpush.msra.mxu1 %v366_v59  ;;  %829 = vmatpush.msra.mxu2 %v259_v62 }
  0x95   : > { %870 = vmatpush.msra.mxu3 %v355_v63  ;;  %590 = vmatmul.f32.vlgmr.msrb.gmra.mxu0 %v1504_v60 }
  0x96   : > { %631 = vmatmul.f32.vlgmr.msrb.gmra.mxu1 %v1507_v61  ;;  %746 = vmatpush.msra.mxu0 %v264_v0 }
  0x97   : > { %787 = vmatpush.msra.mxu1 %v360_v1  ;;  %830 = vmatpush.msra.mxu2 %v253_v2 }
  0x98   : > { %871 = vmatpush.msra.mxu3 %v349_v3  ;;  %747 = vmatpush.msra.mxu0 %v258_v6 }
  0x99   : > { %675 = vmatmul.f32.gmra.mxu2 %v1514_v10  ;;  %788 = vmatpush.msra.mxu1 %v354_v7 }
  0x9a   : > { %716 = vmatmul.f32.gmra.mxu3 %v1517_v11  ;;  %831 = vmatpush.msra.mxu2 %v247_v8 }
  0x9b   : > { %872 = vmatpush.msra.mxu3 %v343_v9  ;;  %748 = vmatpush.msra.mxu0 %v252_v12 }
  0x9c   : > { %789 = vmatpush.msra.mxu1 %v348_v13  ;;  %832 = vmatpush.msra.mxu2 %v241_v14 }
  0x9d   : > { %593 = vmatmul.f32.gmra.mxu0 %v1514_v10  ;;  %873 = vmatpush.msra.mxu3 %v337_v15 }
  0x9e   : > { %634 = vmatmul.f32.gmra.mxu1 %v1517_v11  ;;  %749 = vmatpush.msra.mxu0 %v246_v16 }
  0x9f   : > { %790 = vmatpush.msra.mxu1 %v342_v17  ;;  %833 = vmatpush.msra.mxu2 %v235_v18 }
  0xa0   : > { %874 = vmatpush.msra.mxu3 %v331_v19  ;;  %750 = vmatpush.msra.mxu0 %v240_v22 }
  0xa1   : > { %678 = vmatmul.f32.gmra.mxu2 %v1524_v24  ;;  %791 = vmatpush.msra.mxu1 %v336_v23 }
  0xa2   : > { %719 = vmatmul.f32.gmra.mxu3 %v1527_v25  ;;  %834 = vmatpush.msra.mxu2 %v229_v26 }
  0xa3   : > { %875 = vmatpush.msra.mxu3 %v325_v27  ;;  %751 = vmatpush.msra.mxu0 %v234_v28 }
  0xa4   : > { %792 = vmatpush.msra.mxu1 %v330_v29  ;;  %835 = vmatpush.msra.mxu2 %v223_v30 }
  0xa5   : > { %596 = vmatmul.f32.gmra.mxu0 %v1524_v24  ;;  %876 = vmatpush.msra.mxu3 %v319_v31 }
  0xa6   : > { %637 = vmatmul.f32.gmra.mxu1 %v1527_v25  ;;  %752 = vmatpush.msra.mxu0 %v228_v32 }
  0xa7   : > { %793 = vmatpush.msra.mxu1 %v324_v33 }
  0xa8   : > { %753 = vmatpush.msra.mxu0 %v222_v34 }
  0xa9   : > { %681 = vmatmul.f32.gmra.mxu2 %v1534_v38  ;;  %794 = vmatpush.msra.mxu1 %v318_v35 }
  0xaa   : > { %722 = vmatmul.f32.gmra.mxu3 %v1537_v39 }
  0xad   : > { %599 = vmatmul.f32.gmra.mxu0 %v1534_v38 }
  0xae   : > { %640 = vmatmul.f32.gmra.mxu1 %v1537_v39 }
  0xb1   : > { %684 = vmatmul.f32.gmra.mxu2 %v1544_v52 }
  0xb2   : > { %725 = vmatmul.f32.gmra.mxu3 %v1547_v53 }
  0xb5   : > { %602 = vmatmul.f32.gmra.mxu0 %v1544_v52 }
  0xb6   : > { %643 = vmatmul.f32.gmra.mxu1 %v1547_v53 }
  0xb9   : > { %687 = vmatmul.f32.gmra.mxu2 %v1554_v4 }
  0xba   : > { %728 = vmatmul.f32.gmra.mxu3 %v1557_v5 }
  0xbd   : > { %605 = vmatmul.f32.gmra.mxu0 %v1554_v4 }
  0xbe   : > { %646 = vmatmul.f32.gmra.mxu1 %v1557_v5 }
  0xc1   : > { %690 = vmatmul.f32.gmra.mxu2 %v1564_v20 }
  0xc2   : > { %731 = vmatmul.f32.gmra.mxu3 %v1567_v21 }
  0xc5   : > { %608 = vmatmul.f32.gmra.mxu0 %v1564_v20 }
  0xc6   : > { %649 = vmatmul.f32.gmra.mxu1 %v1567_v21 }
  0xc9   : > { %693 = vmatmul.f32.gmra.mxu2 %v1574_v36 }
  0xca   : > { %734 = vmatmul.f32.gmra.mxu3 %v1577_v37 }
  0xcd   : > { %611 = vmatmul.f32.gmra.mxu0 %v1574_v36 }
  0xce   : > { %652 = vmatmul.f32.gmra.mxu1 %v1577_v37 }
  0xd1   : > { %836 = vmatmul.f32.vlgmr.msra.gmra.mxu2 %v1504_v60 }
  0xd2   : > { %877 = vmatmul.f32.vlgmr.msra.gmra.mxu3 %v1507_v61  ;;  %v427_v40 = vpop.f32.mrf.mxu0 }
  0xd3   : > { %v468_v41 = vpop.f32.mrf.mxu1 }
  0xd4   : > { %v469_v42 = vadd.f32 %v468_v41, %v427_v40  ;;  %v509_v43 = vpop.f32.mrf.mxu2 }
  0xd5   : > { %v550_v44 = vpop.f32.mrf.mxu3  ;;  %754 = vmatmul.f32.vlgmr.msra.gmra.mxu0 %v1504_v60 }
  0xd6   : > { %v551_v45 = vadd.f32 %v550_v44, %v509_v43  ;;  %902 = vst [vmem:[%s1618_s9] sm:$0xff] %v469_v42  ;;  %795 = vmatmul.f32.vlgmr.msra.gmra.mxu1 %v1507_v61 }
  0xd8   : > { %903 = vst [vmem:[%s1618_s9 + $0x8] sm:$0xff] %v551_v45 }
  0xd9   : > { %839 = vmatmul.f32.gmra.mxu2 %v1514_v10 }
  0xda   : > { %880 = vmatmul.f32.gmra.mxu3 %v1517_v11  ;;  %v430_v46 = vpop.f32.mrf.mxu0 }
  0xdb   : > { %v471_v47 = vpop.f32.mrf.mxu1 }
  0xdc   : > { %v472_v48 = vadd.f32 %v471_v47, %v430_v46  ;;  %v512_v49 = vpop.f32.mrf.mxu2 }
  0xdd   : > { %v553_v50 = vpop.f32.mrf.mxu3  ;;  %757 = vmatmul.f32.gmra.mxu0 %v1514_v10 }
  0xde   : > { %v554_v51 = vadd.f32 %v553_v50, %v512_v49  ;;  %908 = vst [vmem:[%s1618_s9 + $0x30] sm:$0xff] %v472_v48  ;;  %798 = vmatmul.f32.gmra.mxu1 %v1517_v11 }
  0xe0   : > { %909 = vst [vmem:[%s1618_s9 + $0x38] sm:$0xff] %v554_v51 }
  0xe1   : > { %842 = vmatmul.f32.gmra.mxu2 %v1524_v24 }
  0xe2   : > { %883 = vmatmul.f32.gmra.mxu3 %v1527_v25  ;;  %v433_v60 = vpop.f32.mrf.mxu0 }
  0xe3   : > { %v474_v61 = vpop.f32.mrf.mxu1 }
  0xe4   : > { %v475_v54 = vadd.f32 %v474_v61, %v433_v60  ;;  %v515_v55 = vpop.f32.mrf.mxu2 }
  0xe5   : > { %v556_v56 = vpop.f32.mrf.mxu3  ;;  %760 = vmatmul.f32.gmra.mxu0 %v1524_v24 }
  0xe6   : > { %v557_v57 = vadd.f32 %v556_v56, %v515_v55  ;;  %914 = vst [vmem:[%s1618_s9 + $0x60] sm:$0xff] %v475_v54  ;;  %801 = vmatmul.f32.gmra.mxu1 %v1527_v25 }
  0xe8   : > { %915 = vst [vmem:[%s1618_s9 + $0x68] sm:$0xff] %v557_v57 }
  0xe9   : > { %845 = vmatmul.f32.gmra.mxu2 %v1534_v38 }
  0xea   : > { %886 = vmatmul.f32.gmra.mxu3 %v1537_v39  ;;  %v436_v10 = vpop.f32.mrf.mxu0 }
  0xeb   : > { %v477_v11 = vpop.f32.mrf.mxu1 }
  0xec   : > { %v478_v58 = vadd.f32 %v477_v11, %v436_v10  ;;  %v518_v59 = vpop.f32.mrf.mxu2 }
  0xed   : > { %v559_v62 = vpop.f32.mrf.mxu3  ;;  %763 = vmatmul.f32.gmra.mxu0 %v1534_v38 }
  0xee   : > { %v560_v63 = vadd.f32 %v559_v62, %v518_v59  ;;  %920 = vst [vmem:[%s1618_s9 + $0x90] sm:$0xff] %v478_v58  ;;  %804 = vmatmul.f32.gmra.mxu1 %v1537_v39 }
  0xf0   : > { %921 = vst [vmem:[%s1618_s9 + $0x98] sm:$0xff] %v560_v63 }
  0xf1   : > { %848 = vmatmul.f32.gmra.mxu2 %v1544_v52 }
  0xf2   : > { %889 = vmatmul.f32.gmra.mxu3 %v1547_v53  ;;  %v439_v24 = vpop.f32.mrf.mxu0 }
  0xf3   : > { %v480_v25 = vpop.f32.mrf.mxu1 }
  0xf4   : > { %v481_v0 = vadd.f32 %v480_v25, %v439_v24  ;;  %v521_v1 = vpop.f32.mrf.mxu2 }
  0xf5   : > { %v562_v2 = vpop.f32.mrf.mxu3  ;;  %766 = vmatmul.f32.gmra.mxu0 %v1544_v52 }
  0xf6   : > { %v563_v3 = vadd.f32 %v562_v2, %v521_v1  ;;  %926 = vst [vmem:[%s1618_s9 + $0xc0] sm:$0xff] %v481_v0  ;;  %807 = vmatmul.f32.gmra.mxu1 %v1547_v53 }
  0xf8   : > { %927 = vst [vmem:[%s1618_s9 + $0xc8] sm:$0xff] %v563_v3 }
  0xf9   : > { %851 = vmatmul.f32.gmra.mxu2 %v1554_v4 }
  0xfa   : > { %892 = vmatmul.f32.gmra.mxu3 %v1557_v5  ;;  %v442_v38 = vpop.f32.mrf.mxu0 }
  0xfb   : > { %v483_v39 = vpop.f32.mrf.mxu1 }
  0xfc   : > { %v484_v6 = vadd.f32 %v483_v39, %v442_v38  ;;  %v524_v7 = vpop.f32.mrf.mxu2 }
  0xfd   : > { %v565_v8 = vpop.f32.mrf.mxu3  ;;  %769 = vmatmul.f32.gmra.mxu0 %v1554_v4 }
  0xfe   : > { %v566_v9 = vadd.f32 %v565_v8, %v524_v7  ;;  %932 = vst [vmem:[%s1618_s9 + $0xf0] sm:$0xff] %v484_v6  ;;  %810 = vmatmul.f32.gmra.mxu1 %v1557_v5 }
 0x100   : > { %933 = vst [vmem:[%s1618_s9 + $0xf8] sm:$0xff] %v566_v9 }
 0x101   : > { %854 = vmatmul.f32.gmra.mxu2 %v1564_v20 }
 0x102   : > { %895 = vmatmul.f32.gmra.mxu3 %v1567_v21  ;;  %v445_v52 = vpop.f32.mrf.mxu0 }
 0x103   : > { %v486_v53 = vpop.f32.mrf.mxu1 }
 0x104   : > { %v487_v12 = vadd.f32 %v486_v53, %v445_v52  ;;  %v527_v13 = vpop.f32.mrf.mxu2 }
 0x105   : > { %v568_v14 = vpop.f32.mrf.mxu3  ;;  %772 = vmatmul.f32.gmra.mxu0 %v1564_v20 }
 0x106   : > { %v569_v15 = vadd.f32 %v568_v14, %v527_v13  ;;  %938 = vst [vmem:[%s1618_s9 + $0x120] sm:$0xff] %v487_v12  ;;  %813 = vmatmul.f32.gmra.mxu1 %v1567_v21 }
 0x108   : > { %939 = vst [vmem:[%s1618_s9 + $0x128] sm:$0xff] %v569_v15 }
 0x109   : > { %857 = vmatmul.f32.gmra.mxu2 %v1574_v36 }
 0x10a   : > { %898 = vmatmul.f32.gmra.mxu3 %v1577_v37  ;;  %v448_v4 = vpop.f32.mrf.mxu0 }
 0x10b   : > { %v489_v5 = vpop.f32.mrf.mxu1 }
 0x10c   : > { %v490_v16 = vadd.f32 %v489_v5, %v448_v4  ;;  %v530_v17 = vpop.f32.mrf.mxu2 }
 0x10d   : > { %v571_v18 = vpop.f32.mrf.mxu3  ;;  %775 = vmatmul.f32.gmra.mxu0 %v1574_v36 }
 0x10e   : > { %v572_v19 = vadd.f32 %v571_v18, %v530_v17  ;;  %944 = vst [vmem:[%s1618_s9 + $0x150] sm:$0xff] %v490_v16  ;;  %816 = vmatmul.f32.gmra.mxu1 %v1577_v37 }
 0x110   : > { %945 = vst [vmem:[%s1618_s9 + $0x158] sm:$0xff] %v572_v19 }
 0x112   : > { %v591_v20 = vpop.f32.mrf.mxu0 }
 0x113   : > { %v632_v21 = vpop.f32.mrf.mxu1 }
 0x114   : > { %v633_v22 = vadd.f32 %v632_v21, %v591_v20  ;;  %v673_v23 = vpop.f32.mrf.mxu2 }
 0x115   : > { %v714_v26 = vpop.f32.mrf.mxu3 }
 0x116   : > { %v715_v27 = vadd.f32 %v714_v26, %v673_v23  ;;  %904 = vst [vmem:[%s1618_s9 + $0x10] sm:$0xff] %v633_v22 }
 0x118   : > { %905 = vst [vmem:[%s1618_s9 + $0x18] sm:$0xff] %v715_v27 }
 0x11a   : > { %v594_v28 = vpop.f32.mrf.mxu0 }
 0x11b   : > { %v635_v29 = vpop.f32.mrf.mxu1 }
 0x11c   : > { %v636_v30 = vadd.f32 %v635_v29, %v594_v28  ;;  %v676_v31 = vpop.f32.mrf.mxu2 }
 0x11d   : > { %v717_v36 = vpop.f32.mrf.mxu3 }
 0x11e   : > { %v718_v32 = vadd.f32 %v717_v36, %v676_v31  ;;  %910 = vst [vmem:[%s1618_s9 + $0x40] sm:$0xff] %v636_v30 }
 0x120   : > { %911 = vst [vmem:[%s1618_s9 + $0x48] sm:$0xff] %v718_v32 }
 0x122   : > { %v597_v37 = vpop.f32.mrf.mxu0 }
 0x123   : > { %v638_v33 = vpop.f32.mrf.mxu1 }
 0x124   : > { %v639_v34 = vadd.f32 %v638_v33, %v597_v37  ;;  %v679_v35 = vpop.f32.mrf.mxu2 }
 0x125   : > { %v720_v40 = vpop.f32.mrf.mxu3 }
 0x126   : > { %v721_v41 = vadd.f32 %v720_v40, %v679_v35  ;;  %916 = vst [vmem:[%s1618_s9 + $0x70] sm:$0xff] %v639_v34 }
 0x128   : > { %917 = vst [vmem:[%s1618_s9 + $0x78] sm:$0xff] %v721_v41 }
 0x12a   : > { %v600_v42 = vpop.f32.mrf.mxu0 }
 0x12b   : > { %v641_v43 = vpop.f32.mrf.mxu1 }
 0x12c   : > { %v642_v44 = vadd.f32 %v641_v43, %v600_v42  ;;  %v682_v45 = vpop.f32.mrf.mxu2 }
 0x12d   : > { %v723_v46 = vpop.f32.mrf.mxu3 }
 0x12e   : > { %v724_v47 = vadd.f32 %v723_v46, %v682_v45  ;;  %922 = vst [vmem:[%s1618_s9 + $0xa0] sm:$0xff] %v642_v44 }
 0x130   : > { %923 = vst [vmem:[%s1618_s9 + $0xa8] sm:$0xff] %v724_v47 }
 0x132   : > { %v603_v48 = vpop.f32.mrf.mxu0 }
 0x133   : > { %v644_v49 = vpop.f32.mrf.mxu1 }
 0x134   : > { %v645_v50 = vadd.f32 %v644_v49, %v603_v48  ;;  %v685_v51 = vpop.f32.mrf.mxu2 }
 0x135   : > { %v726_v60 = vpop.f32.mrf.mxu3 }
 0x136   : > { %v727_v61 = vadd.f32 %v726_v60, %v685_v51  ;;  %928 = vst [vmem:[%s1618_s9 + $0xd0] sm:$0xff] %v645_v50 }
 0x138   : > { %929 = vst [vmem:[%s1618_s9 + $0xd8] sm:$0xff] %v727_v61 }
 0x13a   : > { %v606_v54 = vpop.f32.mrf.mxu0 }
 0x13b   : > { %v647_v55 = vpop.f32.mrf.mxu1 }
 0x13c   : > { %v648_v56 = vadd.f32 %v647_v55, %v606_v54  ;;  %v688_v57 = vpop.f32.mrf.mxu2 }
 0x13d   : > { %v729_v10 = vpop.f32.mrf.mxu3 }
 0x13e   : > { %v730_v11 = vadd.f32 %v729_v10, %v688_v57  ;;  %934 = vst [vmem:[%s1618_s9 + $0x100] sm:$0xff] %v648_v56 }
 0x140   : > { %935 = vst [vmem:[%s1618_s9 + $0x108] sm:$0xff] %v730_v11 }
 0x142   : > { %v609_v58 = vpop.f32.mrf.mxu0 }
 0x143   : > { %v650_v59 = vpop.f32.mrf.mxu1 }
 0x144   : > { %v651_v62 = vadd.f32 %v650_v59, %v609_v58  ;;  %v691_v63 = vpop.f32.mrf.mxu2 }
 0x145   : > { %v732_v24 = vpop.f32.mrf.mxu3 }
 0x146   : > { %v733_v25 = vadd.f32 %v732_v24, %v691_v63  ;;  %940 = vst [vmem:[%s1618_s9 + $0x130] sm:$0xff] %v651_v62 }
 0x148   : > { %941 = vst [vmem:[%s1618_s9 + $0x138] sm:$0xff] %v733_v25 }
 0x14a   : > { %v612_v0 = vpop.f32.mrf.mxu0 }
 0x14b   : > { %v653_v1 = vpop.f32.mrf.mxu1 }
 0x14c   : > { %v654_v2 = vadd.f32 %v653_v1, %v612_v0  ;;  %v694_v3 = vpop.f32.mrf.mxu2 }
 0x14d   : > { %v735_v38 = vpop.f32.mrf.mxu3 }
 0x14e   : > { %v736_v39 = vadd.f32 %v735_v38, %v694_v3  ;;  %946 = vst [vmem:[%s1618_s9 + $0x160] sm:$0xff] %v654_v2 }
 0x150   : > { %947 = vst [vmem:[%s1618_s9 + $0x168] sm:$0xff] %v736_v39 }
 0x152   : > { %v755_v6 = vpop.f32.mrf.mxu0 }
 0x153   : > { %v796_v7 = vpop.f32.mrf.mxu1 }
 0x154   : > { %v797_v8 = vadd.f32 %v796_v7, %v755_v6  ;;  %v837_v9 = vpop.f32.mrf.mxu2 }
 0x155   : > { %v878_v52 = vpop.f32.mrf.mxu3 }
 0x156   : > { %v879_v53 = vadd.f32 %v878_v52, %v837_v9  ;;  %906 = vst [vmem:[%s1618_s9 + $0x20] sm:$0xff] %v797_v8 }
 0x158   : > { %907 = vst [vmem:[%s1618_s9 + $0x28] sm:$0xff] %v879_v53 }
 0x15a   : > { %v758_v12 = vpop.f32.mrf.mxu0 }
 0x15b   : > { %v799_v13 = vpop.f32.mrf.mxu1 }
 0x15c   : > { %v800_v14 = vadd.f32 %v799_v13, %v758_v12  ;;  %v840_v15 = vpop.f32.mrf.mxu2 }
 0x15d   : > { %v881_v4 = vpop.f32.mrf.mxu3 }
 0x15e   : > { %v882_v5 = vadd.f32 %v881_v4, %v840_v15  ;;  %912 = vst [vmem:[%s1618_s9 + $0x50] sm:$0xff] %v800_v14 }
 0x160   : > { %913 = vst [vmem:[%s1618_s9 + $0x58] sm:$0xff] %v882_v5 }
 0x162   : > { %v761_v16 = vpop.f32.mrf.mxu0 }
 0x163   : > { %v802_v17 = vpop.f32.mrf.mxu1 }
 0x164   : > { %v803_v18 = vadd.f32 %v802_v17, %v761_v16  ;;  %v843_v19 = vpop.f32.mrf.mxu2 }
 0x165   : > { %v884_v20 = vpop.f32.mrf.mxu3 }
 0x166   : > { %v885_v21 = vadd.f32 %v884_v20, %v843_v19  ;;  %918 = vst [vmem:[%s1618_s9 + $0x80] sm:$0xff] %v803_v18 }
 0x168   : > { %919 = vst [vmem:[%s1618_s9 + $0x88] sm:$0xff] %v885_v21 }
 0x16a   : > { %v764_v22 = vpop.f32.mrf.mxu0 }
 0x16b   : > { %v805_v23 = vpop.f32.mrf.mxu1 }
 0x16c   : > { %v806_v26 = vadd.f32 %v805_v23, %v764_v22  ;;  %v846_v27 = vpop.f32.mrf.mxu2 }
 0x16d   : > { %v887_v28 = vpop.f32.mrf.mxu3 }
 0x16e   : > { %v888_v29 = vadd.f32 %v887_v28, %v846_v27  ;;  %924 = vst [vmem:[%s1618_s9 + $0xb0] sm:$0xff] %v806_v26 }
 0x170   : > { %925 = vst [vmem:[%s1618_s9 + $0xb8] sm:$0xff] %v888_v29 }
 0x172   : > { %v767_v30 = vpop.f32.mrf.mxu0 }
 0x173   : > { %v808_v31 = vpop.f32.mrf.mxu1 }
 0x174   : > { %v809_v36 = vadd.f32 %v808_v31, %v767_v30  ;;  %v849_v32 = vpop.f32.mrf.mxu2 }
 0x175   : > { %v890_v37 = vpop.f32.mrf.mxu3 }
 0x176   : > { %v891_v33 = vadd.f32 %v890_v37, %v849_v32  ;;  %930 = vst [vmem:[%s1618_s9 + $0xe0] sm:$0xff] %v809_v36 }
 0x178   : > { %931 = vst [vmem:[%s1618_s9 + $0xe8] sm:$0xff] %v891_v33 }
 0x17a   : > { %v770_v34 = vpop.f32.mrf.mxu0 }
 0x17b   : > { %v811_v35 = vpop.f32.mrf.mxu1 }
 0x17c   : > { %v812_v40 = vadd.f32 %v811_v35, %v770_v34  ;;  %v852_v41 = vpop.f32.mrf.mxu2 }
 0x17d   : > { %v893_v42 = vpop.f32.mrf.mxu3 }
 0x17e   : > { %v894_v43 = vadd.f32 %v893_v42, %v852_v41  ;;  %936 = vst [vmem:[%s1618_s9 + $0x110] sm:$0xff] %v812_v40 }
 0x180   : > { %937 = vst [vmem:[%s1618_s9 + $0x118] sm:$0xff] %v894_v43 }
 0x182   : > { %v773_v44 = vpop.f32.mrf.mxu0 }
 0x183   : > { %v814_v45 = vpop.f32.mrf.mxu1 }
 0x184   : > { %v815_v46 = vadd.f32 %v814_v45, %v773_v44  ;;  %v855_v47 = vpop.f32.mrf.mxu2 }
 0x185   : > { %v896_v48 = vpop.f32.mrf.mxu3 }
 0x186   : > { %v897_v49 = vadd.f32 %v896_v48, %v855_v47  ;;  %942 = vst [vmem:[%s1618_s9 + $0x140] sm:$0xff] %v815_v46 }
 0x188   : > { %943 = vst [vmem:[%s1618_s9 + $0x148] sm:$0xff] %v897_v49 }
 0x18a   : > { %v776_v50 = vpop.f32.mrf.mxu0 }
 0x18b   : > { %v817_v51 = vpop.f32.mrf.mxu1 }
 0x18c   : > { %v818_v60 = vadd.f32 %v817_v51, %v776_v50  ;;  %v858_v61 = vpop.f32.mrf.mxu2 }
 0x18d   : > { %v899_v54 = vpop.f32.mrf.mxu3 }
 0x18e   : > { %v900_v55 = vadd.f32 %v899_v54, %v858_v61  ;;  %948 = vst [vmem:[%s1618_s9 + $0x170] sm:$0xff] %v818_v60 }
 0x190   : > { %949 = vst [vmem:[%s1618_s9 + $0x178] sm:$0xff] %v900_v55 }
 0x191   : > { %1273 = shalt.err (!%p1270_p13)
}
 0x192   : > { %s1355_s5 = smov 768   ;;  %s1356_s18 = smov 48  }
 0x193   : > { %1097 = dma.vmem_to_hbm [thread:$0]  (%p1460_p3), %s967_s13, 6144, %s969_s17, %s951_s20, %s1355_s5, %s1355_s5, %s1356_s18  }
 0x194 PF: > { %s1763_s25 = sld [smem:[#allocation11_spill]]  ;;  %p1114_p0 = scmp.ge.s32.totalorder %s1348_s16, 2 }
 0x196   : > { %p1108_p5 = pnand %p1114_p0, %p1431_p6 }
 0x198   : > { %p1109_p7 = pneg %p1108_p5 }
 0x19a   : > { %s983_s9 = sand.u32 1, %s1763_s25  }
 0x19b   : > { %s984_s14 = scalar_lea.sflag [#allocation4], %s983_s9 }
 0x19c   : > { %1315 = dma.done.wait (%p1109_p7), %s984_s14, 6144  }
 0x19d   : > { %1317 = vsyncadd (%p1109_p7), %s984_s14, 4294961152  ;;  %s19_s16 = sadd.s32 1, %s1348_s16   ;;  %s1765_s12 = sld [smem:[#allocation12_spill]] }
 0x19e   : > { %p16_p9 = scmp.ge.s32.totalorder %s19_s16, 6   ;;  %s1766_s14 = sld [smem:[#allocation14_spill]] }
 0x19f   : > { %s1767_s9 = smov %s1324_s10  ;;  %s1768_s10 = smov %s1328_s11 }
 0x1a0   : > { %s1769_s11 = smov %s1477_s29  ;;  %s1770_s13 = smov %s1344_s15 }
 0x1a1   : > { %s1771_s15 = smov %s1777_s4  ;;  %18 = sbr.rel (!%p16_p9) target bundleno = 10 (0xa), region = 77 }
 0x1a6   :  { %990 = vsyncpa [#allocation3], 1 }
 0x1a7   :  { %992 = vsyncpa [#allocation3 + $0x1], 1 }
 0x1a8   :  { %993 = vsyncpa [#allocation6], 1 }
 0x1a9   :  { %994 = vsyncpa [#allocation4], 1 }
 0x1aa   :  { %996 = vsyncpa [#allocation4 + $0x1], 1 }

</bundles_post_ra>
